<compile_context>
chip_gen: v7x
topology: tpu7x:2x2x1
jax: 0.10.0
libtpu: 0.0.40
codegen_flags: <defaults>
</compile_context>

<pallas_src>
import functools

import jax
import jax.numpy as jnp
from jax.experimental import pallas as pl
from jax.experimental.pallas import tpu as pltpu

_MIB = 1024 * 1024


def supermap_kernel(H, W, bc, x_ref, p_ref, loss_ref):
    """Fused conv3x3(4->1, SAME) + L1 + per-element mean for one batch block.

    x_ref   : VMEM (TB, 5, H*W)   channels 0..3 = model input, channel 4 = target
    p_ref   : SMEM (37,) f32      conv weights flattened (kh, kw, c) + bias
    loss_ref: VMEM (1, 8, 128)    broadcast scalar: sum over the TB elements of
                                  the per-element mean L1
    """
    TB = x_ref.shape[0]
    HW = H * W
    n_chunks = TB // bc
    inv_hw = 1.0 / float(HW)

    # ---- hoisted loop invariants (read once per grid step) -----------------
    w = [p_ref[i] for i in range(36)]            # taps, index = kh*12 + kw*4 + c
    bias = p_ref[36]

    idx = jax.lax.broadcasted_iota(jnp.int32, (1, HW), 1)
    col = idx % W
    # Keep jnp.where (select), not mask-multiply, so non-finite border values
    # cannot leak NaN through 0 * Inf.
    m_left = col > 0            # neighbour (h, w-1) is inside the image
    m_right = col < (W - 1)     # neighbour (h, w+1)
    m_up = idx >= W             # neighbour (h-1, w)
    m_down = idx < (HW - W)     # neighbour (h+1, w)

    def conv_l1(sl, acc):
        """acc += |conv3x3(x[sl]) - target[sl]| as a (bc, HW) plane."""
        xs = [x_ref[sl, c, :].astype(jnp.float32) for c in range(4)]   # (bc, HW)
        tgt = x_ref[sl, 4, :].astype(jnp.float32)                      # (bc, HW)

        rows = []
        for kh in range(3):
            a_l = xs[0] * w[kh * 12 + 0]
            a_m = xs[0] * w[kh * 12 + 4]
            a_r = xs[0] * w[kh * 12 + 8]
            for c in range(1, 4):
                a_l = a_l + xs[c] * w[kh * 12 + 0 + c]
                a_m = a_m + xs[c] * w[kh * 12 + 4 + c]
                a_r = a_r + xs[c] * w[kh * 12 + 8 + c]
            if W > 1:
                # kw = 0 (dw = -1): out[.., i] += a_l[.., i-1]; invalid at w == 0.
                a_l = jnp.where(m_left, pltpu.roll(a_l, shift=1, axis=1), 0.0)
                # kw = 2 (dw = +1): out[.., i] += a_r[.., i+1]; invalid at w == W-1.
                a_r = jnp.where(m_right, pltpu.roll(a_r, shift=HW - 1, axis=1), 0.0)
                rows.append(a_m + a_l + a_r)
            else:
                rows.append(a_m)

        out = rows[1] + bias
        if H > 1:
            # kh = 0 (dh = -1): out[.., i] += r0[.., i-W]; invalid at h == 0.
            out = out + jnp.where(m_up, pltpu.roll(rows[0], shift=W, axis=1), 0.0)
            # kh = 2 (dh = +1): out[.., i] += r2[.., i+W]; invalid at h == H-1.
            out = out + jnp.where(m_down, pltpu.roll(rows[2], shift=HW - W, axis=1), 0.0)

        return acc + jnp.abs(out - tgt)

    zero = jnp.zeros((bc, HW), jnp.float32)
    if n_chunks == 1:
        acc = conv_l1(pl.ds(0, bc), zero)
    else:
        def body(i, acc):
            s = pl.multiple_of(i * bc, bc)
            return conv_l1(pl.ds(s, bc), acc)
        # fori_loop bounds vreg live ranges for many chunks; unroll short
        # trip-counts for LLO scheduling visibility.
        acc = jax.lax.fori_loop(0, n_chunks, body, zero, unroll=(n_chunks <= 4))

    # One cross-lane/sublane reduction and one 1/(H*W) multiply per grid step.
    total = jnp.sum(acc) * inv_hw
    loss_ref[...] = jnp.full(loss_ref.shape, total, dtype=jnp.float32)


def _tpu_hw():
    """(tensorcores_per_chip, vmem_capacity_bytes) with conservative fallbacks."""
    num_tc, vmem_cap = 1, 64 * _MIB
    try:
        info = pltpu.get_tpu_info()
        cap = getattr(info, "vmem_capacity_bytes", None)
        if isinstance(cap, int) and cap > 0:
            vmem_cap = cap
        for name in ("num_cores", "core_count", "num_tensorcores", "tensorcore_count"):
            v = getattr(info, name, None)
            if isinstance(v, int) and v > 0:
                num_tc = v
                break
    except Exception:
        pass
    try:
        if "v7" in jax.devices()[0].device_kind.lower():
            num_tc = max(num_tc, 2)   # v7x: 2 TensorCores per chip
    except Exception:
        pass
    return num_tc, vmem_cap


def _pick_tiling(B, HW, itemsize, num_tc, vmem_limit_bytes):
    """tb = batch elements per grid step (largest divisor of B that keeps
    >= 2 'parallel' steps per TensorCore and fits the double-buffered input
    block within a fraction of the VMEM budget); bc = inner chunk (<= 8 so
    batch fills the sublane axis of every vreg)."""
    per_elem = 5 * HW * itemsize
    budget = int(vmem_limit_bytes * 0.7)           # headroom: output + internal scratch
    max_tb = max(1, budget // (2 * per_elem))      # 2x: BlockSpec double buffer
    divisors = [t for t in range(1, B + 1) if B % t == 0 and t <= max_tb] or [1]
    tb = 1
    for min_steps in (max(2, 2 * num_tc), 2, 1):
        ok = [t for t in divisors if B // t >= min_steps]
        if ok:
            tb = max(ok)
            break
    bc = next(c for c in range(min(tb, 8), 0, -1) if tb % c == 0)
    return tb, bc


def supermap_forward(img, weight, bias, *, tb=None):
    """img:    (B, C, H, W) NCHW, C >= 5, any float dtype.
    weight: (3, 3, 4)  conv kernel laid out (kh, kw, c_in), c_out == 1.
    bias:   ()         conv bias.
    Returns scalar f32 loss (mean over batch of per-element mean L1)."""
    B, C, H, W = img.shape
    assert C >= 5
    HW = H * W
    itemsize = jnp.dtype(img.dtype).itemsize

    num_tc, vmem_cap = _tpu_hw()
    vmem_limit = max(32 * _MIB, min(96 * _MIB, int(vmem_cap * 0.6)))

    if tb is None:
        tb, bc = _pick_tiling(B, HW, itemsize, num_tc, vmem_limit)
    else:
        bc = next(c for c in range(min(tb, 8), 0, -1) if tb % c == 0)
    assert B % tb == 0
    steps = B // tb

    # (B, C, H, W) -> (B, 5, H*W): free contiguous view when C == 5; the whole
    # spatial plane is folded onto the lane axis (lane-dense VPU ops, long
    # contiguous DMA rows).  Input dtype is preserved; casts happen per-tile
    # in-kernel.
    x = img[:, :5, :, :].reshape(B, 5, HW)

    params = jnp.concatenate(
        [weight.reshape(-1).astype(jnp.float32),
         jnp.reshape(bias, (1,)).astype(jnp.float32)])   # (37,)

    flops = 80 * B * HW   # ~36 mul + ~44 add/abs per pixel per element
    bytes_accessed = (B * 5 * HW * itemsize + params.size * 4
                      + steps * 8 * 128 * 4)

    kernel = functools.partial(supermap_kernel, H, W, bc)

    per_step = pl.pallas_call(
        kernel,
        out_shape=jax.ShapeDtypeStruct((steps, 8, 128), jnp.float32),
        grid_spec=pltpu.PrefetchScalarGridSpec(
            num_scalar_prefetch=0,
            grid=(steps,),
            in_specs=[
                # Only the 5 needed channels (block 0 along the channel dim);
                # last two block dims equal the full array dims.
                pl.BlockSpec((tb, 5, HW), lambda s: (s, 0, 0)),
                pl.BlockSpec(memory_space=pltpu.MemorySpace.SMEM),
            ],
            out_specs=pl.BlockSpec((1, 8, 128), lambda s: (s, 0, 0)),
        ),
        compiler_params=pltpu.CompilerParams(
            dimension_semantics=("parallel",),
            vmem_limit_bytes=vmem_limit),
        cost_estimate=pl.CostEstimate(
            flops=flops, transcendentals=0, bytes_accessed=bytes_accessed),
    )(x, params)

    # Each step wrote (sum over its tb elements of per-element mean L1).
    return jnp.sum(per_step[:, 0, 0]) / jnp.float32(B)


def reference_forward(img, weight, bias):
    """Pure-JAX reference matching the PyTorch semantics."""
    x = img[:, 0:4, :, :].astype(jnp.float32)
    target = img[:, 4, :, :].astype(jnp.float32)
    # weight (kh, kw, c_in) -> OIHW (1, 4, 3, 3)
    w_oihw = jnp.transpose(weight, (2, 0, 1))[None, ...]
    out = jax.lax.conv_general_dilated(
        x, w_oihw, window_strides=(1, 1), padding="SAME",
        dimension_numbers=("NCHW", "OIHW", "NCHW"))
    out = out[:, 0, :, :] + bias
    loss = jnp.abs(out - target)
    per_batch = jnp.mean(loss.reshape(loss.shape[0], -1), axis=1)
    return jnp.mean(per_batch)


if __name__ == "__main__":
    # Small shapes consistent with the module: 5 channels
    # (4 model-input channels + 1 target channel), 16x16 spatial, batch 4
    # (>= 2 "parallel" grid steps; >= 4 on dual-core v7x).
    B, C, H, W = 4, 5, 16, 16

    key = jax.random.PRNGKey(0)
    k_img, k_w, k_b = jax.random.split(key, 3)

    img = jax.random.normal(k_img, (B, C, H, W), dtype=jnp.float32)
    # Deterministic synthetic "model" parameters (3x3 conv, 4 -> 1 channels).
    weight = 0.1 * jax.random.normal(k_w, (3, 3, 4), dtype=jnp.float32)
    bias = 0.05 * jax.random.normal(k_b, (), dtype=jnp.float32)

    loss = jax.jit(supermap_forward)(img, weight, bias)
    jax.block_until_ready(loss)

    ref = reference_forward(img, weight, bias)
    assert jnp.allclose(loss, ref, rtol=1e-4, atol=1e-5), (loss, ref)

    print("KERNEL_OK")
</pallas_src>

<mosaic_0001>
module attributes {stable_mosaic.version = 11 : i64} {
  func.func @supermap_kernel(%arg0: i32, %arg1: memref<2x5x256xf32, #tpu.memory_space<vmem>>, %arg2: memref<37xf32, #tpu.memory_space<smem>>, %arg3: memref<1x8x128xf32, #tpu.memory_space<vmem>>) attributes {dimension_semantics = [#tpu.dimension_semantics<parallel>], iteration_bounds = array<i64: 2>, scalar_prefetch = 0 : i64, scratch_operands = 0 : i64, tpu.core_type = #tpu.core_type<tc>, window_params = [{transform_indices = @transform_0, window_bounds = array<i64: 2, 5, 256>}, {transform_indices = @transform_1, window_bounds = array<i64: 37>}, {transform_indices = @transform_2, window_bounds = array<i64: 1, 8, 128>}]} {
    %c0 = arith.constant 0 : index
    %0 = memref.load %arg2[%c0] : memref<37xf32, #tpu.memory_space<smem>>
    %c1 = arith.constant 1 : index
    %1 = memref.load %arg2[%c1] : memref<37xf32, #tpu.memory_space<smem>>
    %c2 = arith.constant 2 : index
    %2 = memref.load %arg2[%c2] : memref<37xf32, #tpu.memory_space<smem>>
    %c3 = arith.constant 3 : index
    %3 = memref.load %arg2[%c3] : memref<37xf32, #tpu.memory_space<smem>>
    %c4 = arith.constant 4 : index
    %4 = memref.load %arg2[%c4] : memref<37xf32, #tpu.memory_space<smem>>
    %c5 = arith.constant 5 : index
    %5 = memref.load %arg2[%c5] : memref<37xf32, #tpu.memory_space<smem>>
    %c6 = arith.constant 6 : index
    %6 = memref.load %arg2[%c6] : memref<37xf32, #tpu.memory_space<smem>>
    %c7 = arith.constant 7 : index
    %7 = memref.load %arg2[%c7] : memref<37xf32, #tpu.memory_space<smem>>
    %c8 = arith.constant 8 : index
    %8 = memref.load %arg2[%c8] : memref<37xf32, #tpu.memory_space<smem>>
    %c9 = arith.constant 9 : index
    %9 = memref.load %arg2[%c9] : memref<37xf32, #tpu.memory_space<smem>>
    %c10 = arith.constant 10 : index
    %10 = memref.load %arg2[%c10] : memref<37xf32, #tpu.memory_space<smem>>
    %c11 = arith.constant 11 : index
    %11 = memref.load %arg2[%c11] : memref<37xf32, #tpu.memory_space<smem>>
    %c12 = arith.constant 12 : index
    %12 = memref.load %arg2[%c12] : memref<37xf32, #tpu.memory_space<smem>>
    %c13 = arith.constant 13 : index
    %13 = memref.load %arg2[%c13] : memref<37xf32, #tpu.memory_space<smem>>
    %c14 = arith.constant 14 : index
    %14 = memref.load %arg2[%c14] : memref<37xf32, #tpu.memory_space<smem>>
    %c15 = arith.constant 15 : index
    %15 = memref.load %arg2[%c15] : memref<37xf32, #tpu.memory_space<smem>>
    %c16 = arith.constant 16 : index
    %16 = memref.load %arg2[%c16] : memref<37xf32, #tpu.memory_space<smem>>
    %c17 = arith.constant 17 : index
    %17 = memref.load %arg2[%c17] : memref<37xf32, #tpu.memory_space<smem>>
    %c18 = arith.constant 18 : index
    %18 = memref.load %arg2[%c18] : memref<37xf32, #tpu.memory_space<smem>>
    %c19 = arith.constant 19 : index
    %19 = memref.load %arg2[%c19] : memref<37xf32, #tpu.memory_space<smem>>
    %c20 = arith.constant 20 : index
    %20 = memref.load %arg2[%c20] : memref<37xf32, #tpu.memory_space<smem>>
    %c21 = arith.constant 21 : index
    %21 = memref.load %arg2[%c21] : memref<37xf32, #tpu.memory_space<smem>>
    %c22 = arith.constant 22 : index
    %22 = memref.load %arg2[%c22] : memref<37xf32, #tpu.memory_space<smem>>
    %c23 = arith.constant 23 : index
    %23 = memref.load %arg2[%c23] : memref<37xf32, #tpu.memory_space<smem>>
    %c24 = arith.constant 24 : index
    %24 = memref.load %arg2[%c24] : memref<37xf32, #tpu.memory_space<smem>>
    %c25 = arith.constant 25 : index
    %25 = memref.load %arg2[%c25] : memref<37xf32, #tpu.memory_space<smem>>
    %c26 = arith.constant 26 : index
    %26 = memref.load %arg2[%c26] : memref<37xf32, #tpu.memory_space<smem>>
    %c27 = arith.constant 27 : index
    %27 = memref.load %arg2[%c27] : memref<37xf32, #tpu.memory_space<smem>>
    %c28 = arith.constant 28 : index
    %28 = memref.load %arg2[%c28] : memref<37xf32, #tpu.memory_space<smem>>
    %c29 = arith.constant 29 : index
    %29 = memref.load %arg2[%c29] : memref<37xf32, #tpu.memory_space<smem>>
    %c30 = arith.constant 30 : index
    %30 = memref.load %arg2[%c30] : memref<37xf32, #tpu.memory_space<smem>>
    %c31 = arith.constant 31 : index
    %31 = memref.load %arg2[%c31] : memref<37xf32, #tpu.memory_space<smem>>
    %c32 = arith.constant 32 : index
    %32 = memref.load %arg2[%c32] : memref<37xf32, #tpu.memory_space<smem>>
    %c33 = arith.constant 33 : index
    %33 = memref.load %arg2[%c33] : memref<37xf32, #tpu.memory_space<smem>>
    %c34 = arith.constant 34 : index
    %34 = memref.load %arg2[%c34] : memref<37xf32, #tpu.memory_space<smem>>
    %c35 = arith.constant 35 : index
    %35 = memref.load %arg2[%c35] : memref<37xf32, #tpu.memory_space<smem>>
    %c36 = arith.constant 36 : index
    %36 = memref.load %arg2[%c36] : memref<37xf32, #tpu.memory_space<smem>>
    %37 = tpu.iota {dimensions = array<i32: 1>} : vector<1x256xi32>
    %c16_i32 = arith.constant 16 : i32
    %c0_i32 = arith.constant 0 : i32
    %38 = arith.cmpi eq, %c16_i32, %c0_i32 : i32
    %c1_i32 = arith.constant 1 : i32
    %39 = arith.select %38, %c1_i32, %c16_i32 : i32
    %40 = vector.broadcast %39 : i32 to vector<1x256xi32>
    %41 = arith.remsi %37, %40 : vector<1x256xi32>
    %c0_i32_0 = arith.constant 0 : i32
    %42 = vector.broadcast %c0_i32_0 : i32 to vector<1x256xi32>
    %43 = arith.cmpi ne, %41, %42 : vector<1x256xi32>
    %c0_i32_1 = arith.constant 0 : i32
    %44 = vector.broadcast %c0_i32_1 : i32 to vector<1x256xi32>
    %45 = arith.cmpi slt, %41, %44 : vector<1x256xi32>
    %c0_i32_2 = arith.constant 0 : i32
    %46 = arith.cmpi slt, %39, %c0_i32_2 : i32
    %47 = vector.broadcast %46 : i1 to vector<1x256xi1>
    %48 = vector.broadcast %47 : vector<1x256xi1> to vector<1x256xi1>
    %49 = arith.xori %45, %48 : vector<1x256xi1>
    %50 = arith.andi %49, %43 : vector<1x256xi1>
    %51 = vector.broadcast %39 : i32 to vector<1x256xi32>
    %52 = arith.addi %41, %51 : vector<1x256xi32>
    %53 = arith.select %50, %52, %41 : vector<1x256xi1>, vector<1x256xi32>
    %c0_i32_3 = arith.constant 0 : i32
    %54 = vector.broadcast %c0_i32_3 : i32 to vector<1x256xi32>
    %55 = arith.cmpi sgt, %53, %54 : vector<1x256xi32>
    %c15_i32 = arith.constant 15 : i32
    %56 = vector.broadcast %c15_i32 : i32 to vector<1x256xi32>
    %57 = arith.cmpi slt, %53, %56 : vector<1x256xi32>
    %c16_i32_4 = arith.constant 16 : i32
    %58 = vector.broadcast %c16_i32_4 : i32 to vector<1x256xi32>
    %59 = arith.cmpi sge, %37, %58 : vector<1x256xi32>
    %c240_i32 = arith.constant 240 : i32
    %60 = vector.broadcast %c240_i32 : i32 to vector<1x256xi32>
    %61 = arith.cmpi slt, %37, %60 : vector<1x256xi32>
    %cst = arith.constant 0.000000e+00 : f32
    %62 = vector.broadcast %cst : f32 to vector<2x256xf32>
    %c0_5 = arith.constant 0 : index
    %c0_6 = arith.constant 0 : index
    %c0_7 = arith.constant 0 : index
    %63 = vector.load %arg1[%c0_5, %c0_6, %c0_7] : memref<2x5x256xf32, #tpu.memory_space<vmem>>, vector<2x1x256xf32>
    %64 = vector.shape_cast %63 : vector<2x1x256xf32> to vector<2x256xf32>
    %c0_8 = arith.constant 0 : index
    %c1_9 = arith.constant 1 : index
    %c0_10 = arith.constant 0 : index
    %65 = vector.load %arg1[%c0_8, %c1_9, %c0_10] : memref<2x5x256xf32, #tpu.memory_space<vmem>>, vector<2x1x256xf32>
    %66 = vector.shape_cast %65 : vector<2x1x256xf32> to vector<2x256xf32>
    %c0_11 = arith.constant 0 : index
    %c2_12 = arith.constant 2 : index
    %c0_13 = arith.constant 0 : index
    %67 = vector.load %arg1[%c0_11, %c2_12, %c0_13] : memref<2x5x256xf32, #tpu.memory_space<vmem>>, vector<2x1x256xf32>
    %68 = vector.shape_cast %67 : vector<2x1x256xf32> to vector<2x256xf32>
    %c0_14 = arith.constant 0 : index
    %c3_15 = arith.constant 3 : index
    %c0_16 = arith.constant 0 : index
    %69 = vector.load %arg1[%c0_14, %c3_15, %c0_16] : memref<2x5x256xf32, #tpu.memory_space<vmem>>, vector<2x1x256xf32>
    %70 = vector.shape_cast %69 : vector<2x1x256xf32> to vector<2x256xf32>
    %c0_17 = arith.constant 0 : index
    %c4_18 = arith.constant 4 : index
    %c0_19 = arith.constant 0 : index
    %71 = vector.load %arg1[%c0_17, %c4_18, %c0_19] : memref<2x5x256xf32, #tpu.memory_space<vmem>>, vector<2x1x256xf32>
    %72 = vector.shape_cast %71 : vector<2x1x256xf32> to vector<2x256xf32>
    %73 = vector.broadcast %0 : f32 to vector<2x256xf32>
    %74 = arith.mulf %64, %73 : vector<2x256xf32>
    %75 = vector.broadcast %4 : f32 to vector<2x256xf32>
    %76 = arith.mulf %64, %75 : vector<2x256xf32>
    %77 = vector.broadcast %8 : f32 to vector<2x256xf32>
    %78 = arith.mulf %64, %77 : vector<2x256xf32>
    %79 = vector.broadcast %1 : f32 to vector<2x256xf32>
    %80 = arith.mulf %66, %79 : vector<2x256xf32>
    %81 = arith.addf %74, %80 : vector<2x256xf32>
    %82 = vector.broadcast %5 : f32 to vector<2x256xf32>
    %83 = arith.mulf %66, %82 : vector<2x256xf32>
    %84 = arith.addf %76, %83 : vector<2x256xf32>
    %85 = vector.broadcast %9 : f32 to vector<2x256xf32>
    %86 = arith.mulf %66, %85 : vector<2x256xf32>
    %87 = arith.addf %78, %86 : vector<2x256xf32>
    %88 = vector.broadcast %2 : f32 to vector<2x256xf32>
    %89 = arith.mulf %68, %88 : vector<2x256xf32>
    %90 = arith.addf %81, %89 : vector<2x256xf32>
    %91 = vector.broadcast %6 : f32 to vector<2x256xf32>
    %92 = arith.mulf %68, %91 : vector<2x256xf32>
    %93 = arith.addf %84, %92 : vector<2x256xf32>
    %94 = vector.broadcast %10 : f32 to vector<2x256xf32>
    %95 = arith.mulf %68, %94 : vector<2x256xf32>
    %96 = arith.addf %87, %95 : vector<2x256xf32>
    %97 = vector.broadcast %3 : f32 to vector<2x256xf32>
    %98 = arith.mulf %70, %97 : vector<2x256xf32>
    %99 = arith.addf %90, %98 : vector<2x256xf32>
    %100 = vector.broadcast %7 : f32 to vector<2x256xf32>
    %101 = arith.mulf %70, %100 : vector<2x256xf32>
    %102 = arith.addf %93, %101 : vector<2x256xf32>
    %103 = vector.broadcast %11 : f32 to vector<2x256xf32>
    %104 = arith.mulf %70, %103 : vector<2x256xf32>
    %105 = arith.addf %96, %104 : vector<2x256xf32>
    %c1_i32_20 = arith.constant 1 : i32
    %106 = tpu.dynamic_rotate %99 by %c1_i32_20 dim 1 : vector<2x256xf32>, i32 -> vector<2x256xf32>
    %cst_21 = arith.constant 0.000000e+00 : f32
    %107 = vector.shape_cast %55 : vector<1x256xi1> to vector<1x256xi1>
    %108 = vector.broadcast %107 : vector<1x256xi1> to vector<2x256xi1>
    %109 = vector.broadcast %cst_21 : f32 to vector<2x256xf32>
    %110 = arith.select %108, %106, %109 : vector<2x256xi1>, vector<2x256xf32>
    %c255_i32 = arith.constant 255 : i32
    %111 = tpu.dynamic_rotate %105 by %c255_i32 dim 1 : vector<2x256xf32>, i32 -> vector<2x256xf32>
    %cst_22 = arith.constant 0.000000e+00 : f32
    %112 = vector.shape_cast %57 : vector<1x256xi1> to vector<1x256xi1>
    %113 = vector.broadcast %112 : vector<1x256xi1> to vector<2x256xi1>
    %114 = vector.broadcast %cst_22 : f32 to vector<2x256xf32>
    %115 = arith.select %113, %111, %114 : vector<2x256xi1>, vector<2x256xf32>
    %116 = arith.addf %102, %110 : vector<2x256xf32>
    %117 = arith.addf %116, %115 : vector<2x256xf32>
    %118 = vector.broadcast %12 : f32 to vector<2x256xf32>
    %119 = arith.mulf %64, %118 : vector<2x256xf32>
    %120 = vector.broadcast %16 : f32 to vector<2x256xf32>
    %121 = arith.mulf %64, %120 : vector<2x256xf32>
    %122 = vector.broadcast %20 : f32 to vector<2x256xf32>
    %123 = arith.mulf %64, %122 : vector<2x256xf32>
    %124 = vector.broadcast %13 : f32 to vector<2x256xf32>
    %125 = arith.mulf %66, %124 : vector<2x256xf32>
    %126 = arith.addf %119, %125 : vector<2x256xf32>
    %127 = vector.broadcast %17 : f32 to vector<2x256xf32>
    %128 = arith.mulf %66, %127 : vector<2x256xf32>
    %129 = arith.addf %121, %128 : vector<2x256xf32>
    %130 = vector.broadcast %21 : f32 to vector<2x256xf32>
    %131 = arith.mulf %66, %130 : vector<2x256xf32>
    %132 = arith.addf %123, %131 : vector<2x256xf32>
    %133 = vector.broadcast %14 : f32 to vector<2x256xf32>
    %134 = arith.mulf %68, %133 : vector<2x256xf32>
    %135 = arith.addf %126, %134 : vector<2x256xf32>
    %136 = vector.broadcast %18 : f32 to vector<2x256xf32>
    %137 = arith.mulf %68, %136 : vector<2x256xf32>
    %138 = arith.addf %129, %137 : vector<2x256xf32>
    %139 = vector.broadcast %22 : f32 to vector<2x256xf32>
    %140 = arith.mulf %68, %139 : vector<2x256xf32>
    %141 = arith.addf %132, %140 : vector<2x256xf32>
    %142 = vector.broadcast %15 : f32 to vector<2x256xf32>
    %143 = arith.mulf %70, %142 : vector<2x256xf32>
    %144 = arith.addf %135, %143 : vector<2x256xf32>
    %145 = vector.broadcast %19 : f32 to vector<2x256xf32>
    %146 = arith.mulf %70, %145 : vector<2x256xf32>
    %147 = arith.addf %138, %146 : vector<2x256xf32>
    %148 = vector.broadcast %23 : f32 to vector<2x256xf32>
    %149 = arith.mulf %70, %148 : vector<2x256xf32>
    %150 = arith.addf %141, %149 : vector<2x256xf32>
    %c1_i32_23 = arith.constant 1 : i32
    %151 = tpu.dynamic_rotate %144 by %c1_i32_23 dim 1 : vector<2x256xf32>, i32 -> vector<2x256xf32>
    %cst_24 = arith.constant 0.000000e+00 : f32
    %152 = vector.shape_cast %55 : vector<1x256xi1> to vector<1x256xi1>
    %153 = vector.broadcast %152 : vector<1x256xi1> to vector<2x256xi1>
    %154 = vector.broadcast %cst_24 : f32 to vector<2x256xf32>
    %155 = arith.select %153, %151, %154 : vector<2x256xi1>, vector<2x256xf32>
    %c255_i32_25 = arith.constant 255 : i32
    %156 = tpu.dynamic_rotate %150 by %c255_i32_25 dim 1 : vector<2x256xf32>, i32 -> vector<2x256xf32>
    %cst_26 = arith.constant 0.000000e+00 : f32
    %157 = vector.shape_cast %57 : vector<1x256xi1> to vector<1x256xi1>
    %158 = vector.broadcast %157 : vector<1x256xi1> to vector<2x256xi1>
    %159 = vector.broadcast %cst_26 : f32 to vector<2x256xf32>
    %160 = arith.select %158, %156, %159 : vector<2x256xi1>, vector<2x256xf32>
    %161 = arith.addf %147, %155 : vector<2x256xf32>
    %162 = arith.addf %161, %160 : vector<2x256xf32>
    %163 = vector.broadcast %24 : f32 to vector<2x256xf32>
    %164 = arith.mulf %64, %163 : vector<2x256xf32>
    %165 = vector.broadcast %28 : f32 to vector<2x256xf32>
    %166 = arith.mulf %64, %165 : vector<2x256xf32>
    %167 = vector.broadcast %32 : f32 to vector<2x256xf32>
    %168 = arith.mulf %64, %167 : vector<2x256xf32>
    %169 = vector.broadcast %25 : f32 to vector<2x256xf32>
    %170 = arith.mulf %66, %169 : vector<2x256xf32>
    %171 = arith.addf %164, %170 : vector<2x256xf32>
    %172 = vector.broadcast %29 : f32 to vector<2x256xf32>
    %173 = arith.mulf %66, %172 : vector<2x256xf32>
    %174 = arith.addf %166, %173 : vector<2x256xf32>
    %175 = vector.broadcast %33 : f32 to vector<2x256xf32>
    %176 = arith.mulf %66, %175 : vector<2x256xf32>
    %177 = arith.addf %168, %176 : vector<2x256xf32>
    %178 = vector.broadcast %26 : f32 to vector<2x256xf32>
    %179 = arith.mulf %68, %178 : vector<2x256xf32>
    %180 = arith.addf %171, %179 : vector<2x256xf32>
    %181 = vector.broadcast %30 : f32 to vector<2x256xf32>
    %182 = arith.mulf %68, %181 : vector<2x256xf32>
    %183 = arith.addf %174, %182 : vector<2x256xf32>
    %184 = vector.broadcast %34 : f32 to vector<2x256xf32>
    %185 = arith.mulf %68, %184 : vector<2x256xf32>
    %186 = arith.addf %177, %185 : vector<2x256xf32>
    %187 = vector.broadcast %27 : f32 to vector<2x256xf32>
    %188 = arith.mulf %70, %187 : vector<2x256xf32>
    %189 = arith.addf %180, %188 : vector<2x256xf32>
    %190 = vector.broadcast %31 : f32 to vector<2x256xf32>
    %191 = arith.mulf %70, %190 : vector<2x256xf32>
    %192 = arith.addf %183, %191 : vector<2x256xf32>
    %193 = vector.broadcast %35 : f32 to vector<2x256xf32>
    %194 = arith.mulf %70, %193 : vector<2x256xf32>
    %195 = arith.addf %186, %194 : vector<2x256xf32>
    %c1_i32_27 = arith.constant 1 : i32
    %196 = tpu.dynamic_rotate %189 by %c1_i32_27 dim 1 : vector<2x256xf32>, i32 -> vector<2x256xf32>
    %cst_28 = arith.constant 0.000000e+00 : f32
    %197 = vector.shape_cast %55 : vector<1x256xi1> to vector<1x256xi1>
    %198 = vector.broadcast %197 : vector<1x256xi1> to vector<2x256xi1>
    %199 = vector.broadcast %cst_28 : f32 to vector<2x256xf32>
    %200 = arith.select %198, %196, %199 : vector<2x256xi1>, vector<2x256xf32>
    %c255_i32_29 = arith.constant 255 : i32
    %201 = tpu.dynamic_rotate %195 by %c255_i32_29 dim 1 : vector<2x256xf32>, i32 -> vector<2x256xf32>
    %cst_30 = arith.constant 0.000000e+00 : f32
    %202 = vector.shape_cast %57 : vector<1x256xi1> to vector<1x256xi1>
    %203 = vector.broadcast %202 : vector<1x256xi1> to vector<2x256xi1>
    %204 = vector.broadcast %cst_30 : f32 to vector<2x256xf32>
    %205 = arith.select %203, %201, %204 : vector<2x256xi1>, vector<2x256xf32>
    %206 = arith.addf %192, %200 : vector<2x256xf32>
    %207 = arith.addf %206, %205 : vector<2x256xf32>
    %208 = vector.broadcast %36 : f32 to vector<2x256xf32>
    %209 = arith.addf %162, %208 : vector<2x256xf32>
    %c16_i32_31 = arith.constant 16 : i32
    %210 = tpu.dynamic_rotate %117 by %c16_i32_31 dim 1 : vector<2x256xf32>, i32 -> vector<2x256xf32>
    %cst_32 = arith.constant 0.000000e+00 : f32
    %211 = vector.shape_cast %59 : vector<1x256xi1> to vector<1x256xi1>
    %212 = vector.broadcast %211 : vector<1x256xi1> to vector<2x256xi1>
    %213 = vector.broadcast %cst_32 : f32 to vector<2x256xf32>
    %214 = arith.select %212, %210, %213 : vector<2x256xi1>, vector<2x256xf32>
    %215 = arith.addf %209, %214 : vector<2x256xf32>
    %c240_i32_33 = arith.constant 240 : i32
    %216 = tpu.dynamic_rotate %207 by %c240_i32_33 dim 1 : vector<2x256xf32>, i32 -> vector<2x256xf32>
    %cst_34 = arith.constant 0.000000e+00 : f32
    %217 = vector.shape_cast %61 : vector<1x256xi1> to vector<1x256xi1>
    %218 = vector.broadcast %217 : vector<1x256xi1> to vector<2x256xi1>
    %219 = vector.broadcast %cst_34 : f32 to vector<2x256xf32>
    %220 = arith.select %218, %216, %219 : vector<2x256xi1>, vector<2x256xf32>
    %221 = arith.addf %215, %220 : vector<2x256xf32>
    %222 = arith.subf %221, %72 : vector<2x256xf32>
    %223 = math.absf %222 : vector<2x256xf32>
    %224 = arith.addf %62, %223 : vector<2x256xf32>
    %225 = vector.shape_cast %224 : vector<2x256xf32> to vector<1x2x256xf32>
    %cst_35 = arith.constant dense<0.000000e+00> : vector<1xf32>
    %226 = vector.multi_reduction <add>, %225, %cst_35 [1, 2] : vector<1x2x256xf32> to vector<1xf32>
    %227 = vector.shape_cast %226 : vector<1xf32> to vector<1x1x1xf32>
    %228 = vector.extract %227[0, 0, 0] : f32 from vector<1x1x1xf32>
    %cst_36 = arith.constant 3.906250e-03 : f32
    %229 = arith.mulf %228, %cst_36 : f32
    %230 = vector.broadcast %229 : f32 to vector<1x8x128xf32>
    %c0_37 = arith.constant 0 : index
    %c0_38 = arith.constant 0 : index
    %c0_39 = arith.constant 0 : index
    %231 = vector.load %arg3[%c0_37, %c0_38, %c0_39] : memref<1x8x128xf32, #tpu.memory_space<vmem>>, vector<1x8x128xf32>
    tpu.vector_store %arg3[%c0_37, %c0_38, %c0_39], %230 {strides = array<i32>} : memref<1x8x128xf32, #tpu.memory_space<vmem>>, vector<1x8x128xf32>,
    return
  }
  func.func @transform_0(%arg0: i32) -> (i32, i32, i32) {
    %c0_i32 = arith.constant 0 : i32
    %c0_i32_0 = arith.constant 0 : i32
    %c0_i32_1 = arith.constant 0 : i32
    return %arg0, %c0_i32, %c0_i32_0 : i32, i32, i32
  }
  func.func @transform_1(%arg0: i32) -> i32 {
    %c0_i32 = arith.constant 0 : i32
    %c0_i32_0 = arith.constant 0 : i32
    return %c0_i32 : i32
  }
  func.func @transform_2(%arg0: i32) -> (i32, i32, i32) {
    %c0_i32 = arith.constant 0 : i32
    %c0_i32_0 = arith.constant 0 : i32
    %c0_i32_1 = arith.constant 0 : i32
    return %arg0, %c0_i32, %c0_i32_0 : i32, i32, i32
  }
}

</mosaic_0001>

<bundles_post_ra>
// kernel: supermap_forward.1
= control target key start
LH: loop header
LB: loop body
LE: loop exit
PB: predicated region body
PF: predicated region fallthrough
CT: control target
= control target key end

     0   :  { %7 = vsyncpa [#allocation3], 0  ;;  %s1196_s9 = smov 0   ;;  %s1579_s0 = inlined_call_operand.vmem [shape: f32[4,5,256], index: 0, kind: input, shape index: {}]   ;;  %s1580_s1 = inlined_call_operand.vmem [shape: f32[37], index: 1, kind: input, shape index: {}]   ;;  %s1581_s2 = inlined_call_operand.vmem [shape: f32[2,8,128], index: 2, kind: output, shape index: {}]  }
   0x1 LB: > { %s1202_s10 = sadd.s32 4294967295, %s1173_s9   ;;  %p1065_p0 = scmp.ge.s32.totalorder %s1173_s9, 1  ;;  %s1173_s9 = sphi %s1196_s9, %s13_s9  }
   0x2   : > { %p91_p1 = scmp.lt.s32.totalorder %s1173_s9, 3  ;;  %s104_s13 = sshll.u32 %s1580_s1, 4  ;;  %s105_s13 = int_to_ptr.vmem [resolvable:$true] %s104_s13 }
   0x3   : > { %p1132_p3 = scmp.eq.s32.totalorder %s1202_s10, 0  ;;  %s1148_s15 = scalar_lea.vmem %s105_s13, 16 }
   0x4   : > { %p1209_p2 = pnand %p1065_p0, %p91_p1  ;;  %p1149_p6 = scmp.ne.s32.totalorder %s105_s13, %s1148_s15 }
   0x5   : > { %p1156_p10 = scmp.lt.s32.totalorder %s105_s13, %s105_s13  ;;  %p1157_p11 = scmp.lt.s32.totalorder %s1148_s15, %s1148_s15 }
   0x6   : > { %p1128_p4 = pneg %p1209_p2 }
   0x7   : > { %p1158_p12 = por %p1157_p11, %p1156_p10 }
   0x8   : > { %p1129_p5 = pnand %p1132_p3, %p1128_p4 }
   0xa   : > { %p1150_p7 = pneg %p1129_p5 }
   0xc   : > { %p1151_p8 = pnand %p1150_p7, %p1149_p6 }
   0xe   : > { %p1152_p9 = pneg %p1151_p8 }
  0x10   : > { %p1159_p13 = pnand %p1158_p12, %p1152_p9 }
  0x12   : > { %1162 = shalt.err (!%p1159_p13)
}
  0x13   : > { %s1175_s16 = smov [#allocation2]   ;;  %127 = sbr.rel (%p1209_p2) target bundleno = 557 (0x22d), region = 28 }
  0x14   : > { %1131 = dma.vmem_to_smem (!%p1129_p5), %s105_s13, 16, %s1175_s16, [#allocation3]  }
  0x1a   : > { %1168 = dma.done.wait (%p1132_p3), [#allocation3], 16  }
  0x1b   : > { %1170 = vsyncadd (%p1132_p3), [#allocation3], 4294967280 }
  0x1c   : > { %133 = sfence }
  0x1d   : > { %s1070_s17 = sshll.u32 %s1202_s10, 1  ;;  %s1081_s18 = sld [smem:[#allocation2 + $0x8]]  ;;  %v198_v0 = vlaneseq  ;;  %v1176_v2 = vmov 1966171168   ;;  %vm982_vm10 = vcmask 1041408  }
  0x1e   : > { %p151_p0 = scmp.lt.s32.totalorder %s1070_s17, 3  ;;  %s1082_s19 = sld [smem:[#allocation2 + $0x9]]  ;;  %v310_v3 = vunpack.c.l.s4 %v1176_v2 }
  0x1f   : > { %s1083_s20 = sld [smem:[#allocation2 + $0xa]]  ;;  %s1225_s21 = sld [smem:[#allocation2 + $0xb]]  ;;  %v313_v4 = vshrl.u32 %v198_v0, 7 }
  0x20   : > { %s1592_s17 = smov (!%p151_p0, %s1070_s17), 3  ;;  %s1227_s22 = sld [smem:[#allocation2]]  ;;  %v311_v22 = vunpack.c.0.s8 %v310_v3 }
  0x21   : > { %s1121_s23 = sshll.u32 %s1592_s17, 4  ;;  %s1229_s24 = sld [smem:[#allocation2 + $0x1]] }
  0x22   : > { %s1234_s27 = scalar_lea.vmem %s1579_s0, %s1121_s23  ;;  %s1237_s28 = sld [smem:[#allocation2 + $0x2]]  ;;  %v1283_v36 = vsub.s32 %v311_v22, %v313_v4 }
  0x23   : > { %v258_v1 = vstv %s1081_s18  ;;  %v1240_v5 = vld [vmem:[%s1234_s27] ss:$8 sm:$0x3]  ;;  %v1243_v6 = vld [vmem:[%s1234_s27 + $0x10] ss:$8 sm:$0x3] }
  0x24   : > { %v271_v7 = vstv %s1082_s19  ;;  %v1246_v8 = vld [vmem:[%s1234_s27 + $0x1] ss:$8 sm:$0x3]  ;;  %v1249_v9 = vld [vmem:[%s1234_s27 + $0x11] ss:$8 sm:$0x3]  ;;  %v259_v10 = vmul.f32 %v258_v1, %v1240_v5  ;;  %v260_v11 = vmul.f32 %v1243_v6, %v258_v1 }
  0x25   : > { %v286_v12 = vstv %s1083_s20  ;;  %v301_v13 = vstv %s1225_s21  ;;  %v1255_v14 = vld [vmem:[%s1234_s27 + $0x2] ss:$8 sm:$0x3]  ;;  %v1258_v15 = vld [vmem:[%s1234_s27 + $0x12] ss:$8 sm:$0x3]  ;;  %v272_v16 = vmul.f32 %v1246_v8, %v271_v7  ;;  %v273_v17 = vmul.f32 %v1249_v9, %v271_v7 }
  0x26   : > { %v1263_v18 = vld [vmem:[%s1234_s27 + $0x3] ss:$8 sm:$0x3]  ;;  %v1266_v19 = vld [vmem:[%s1234_s27 + $0x13] ss:$8 sm:$0x3]  ;;  %v287_v20 = vmul.f32 %v1255_v14, %v286_v12  ;;  %v288_v21 = vmul.f32 %v1258_v15, %v286_v12  ;;  %v252_v23 = vstv %s1227_s22 }
  0x27   : > { %v274_v24 = vadd.f32 %v272_v16, %v259_v10  ;;  %v275_v25 = vadd.f32 %v273_v17, %v260_v11  ;;  %v302_v26 = vmul.f32 %v1263_v18, %v301_v13  ;;  %v303_v27 = vmul.f32 %v1266_v19, %v301_v13  ;;  %s1076_s29 = sld [smem:[#allocation2 + $0x3]]  ;;  %s1097_s30 = sld [smem:[#allocation2 + $0x18]] }
  0x28   : > { %v253_v28 = vmul.f32 %v252_v23, %v1240_v5  ;;  %v254_v29 = vmul.f32 %v1243_v6, %v252_v23  ;;  %v261_v30 = vstv %s1229_s24  ;;  %v276_v31 = vstv %s1237_s28  ;;  %s1277_s3 = sld [smem:[#allocation2 + $0x19]]  ;;  %s1281_s4 = sld [smem:[#allocation2 + $0x1a]] }
  0x29   : > { %v289_v32 = vadd.f32 %v287_v20, %v274_v24  ;;  %v290_v33 = vadd.f32 %v288_v21, %v275_v25  ;;  %v262_v34 = vmul.f32 %v1246_v8, %v261_v30  ;;  %v263_v35 = vmul.f32 %v1249_v9, %v261_v30  ;;  %s1287_s5 = sld [smem:[#allocation2 + $0x1b]]  ;;  %s1289_s6 = sld [smem:[#allocation2 + $0x20]] }
  0x2a   : > { %v277_v37 = vmul.f32 %v1255_v14, %v276_v31  ;;  %v278_v38 = vmul.f32 %v1258_v15, %v276_v31  ;;  %s1291_s7 = sld [smem:[#allocation2 + $0x21]]  ;;  %s1300_s8 = sld [smem:[#allocation2 + $0x22]] }
  0x2b   : > { %v304_v39 = vadd.f32 %v302_v26, %v289_v32  ;;  %v305_v40 = vadd.f32 %v303_v27, %v290_v33  ;;  %v264_v41 = vadd.f32 %v262_v34, %v253_v28  ;;  %v265_v42 = vadd.f32 %v263_v35, %v254_v29  ;;  %s1302_s11 = sld [smem:[#allocation2 + $0x23]]  ;;  %s1177_s12 = smov 127  }
  0x2c   : > { %s1314_s13 = sld [smem:[#allocation2 + $0x1c]]  ;;  %s1322_s14 = sld [smem:[#allocation2 + $0x1d]] }
  0x2d   : > { %v348_v43 = vcombine.low %v304_v39, %v305_v40  ;;  %v279_v44 = vadd.f32 %v277_v37, %v264_v41  ;;  %v280_v45 = vadd.f32 %v278_v38, %v265_v42  ;;  %v291_v46 = vstv %s1076_s29  ;;  %s1324_s15 = sld [smem:[#allocation2 + $0x1e]]  ;;  %s1331_s16 = sld [smem:[#allocation2 + $0x1f]] }
  0x2e   : > { %v292_v47 = vmul.f32 %v1263_v18, %v291_v46  ;;  %v293_v48 = vmul.f32 %v1266_v19, %v291_v46  ;;  %v626_v49 = vstv %s1097_s30  ;;  %v635_v50 = vstv %s1277_s3  ;;  %s1333_s17 = sld [smem:[#allocation2 + $0x4]]  ;;  %s1178_s18 = smov 1  }
  0x2f   : > { %v355_v51 = vrot.slane %v348_v43, %v1283_v36  ;;  %v627_v52 = vmul.f32 %v626_v49, %v1240_v5  ;;  %v628_v53 = vmul.f32 %v1243_v6, %v626_v49  ;;  %v636_v54 = vmul.f32 %v1246_v8, %v635_v50  ;;  %s1340_s19 = sld [smem:[#allocation2 + $0x5]]  ;;  %s1345_s20 = sld [smem:[#allocation2 + $0x6]] }
  0x30   : > { %v294_v55 = vadd.f32 %v292_v47, %v279_v44  ;;  %v295_v56 = vadd.f32 %v293_v48, %v280_v45  ;;  %v637_v57 = vmul.f32 %v1249_v9, %v635_v50  ;;  %v650_v58 = vstv %s1281_s4  ;;  %s1347_s21 = sld [smem:[#allocation2 + $0x7]]  ;;  %s1354_s22 = sld [smem:[#allocation2 + $0xc]] }
  0x31   : > { %v363_v59 = vrot.slane %v355_v51, %v1283_v36  ;;  %v356_v60 = vcombine.high %v355_v51, %v355_v51  ;;  %v638_v61 = vadd.f32 %v636_v54, %v627_v52  ;;  %v651_v62 = vmul.f32 %v1255_v14, %v650_v58  ;;  %s1361_s23 = sld [smem:[#allocation2 + $0xd]]  ;;  %s1363_s24 = sld [smem:[#allocation2 + $0xe]] }
  0x32   : > { %v308_v63 = vcombine.low %v294_v55, %v295_v56  ;;  %v639_v1 = vadd.f32 %v637_v57, %v628_v53  ;;  %v652_v2 = vmul.f32 %v1258_v15, %v650_v58  ;;  %v665_v3 = vstv %s1287_s5  ;;  %s1375_s25 = sld [smem:[#allocation2 + $0xf]]  ;;  %s1377_s26 = sld [smem:[#allocation2 + $0x14]] }
  0x33   : > { %373 = vrot.lane.b32.xlu1 %v363_v59, %s1177_s12  ;;  %v370_v4 = vrot.slane %v356_v60, %v1283_v36  ;;  %v653_v7 = vadd.f32 %v651_v62, %v638_v61  ;;  %v666_v10 = vmul.f32 %v1263_v18, %v665_v3  ;;  %v667_v11 = vmul.f32 %v1266_v19, %v665_v3  ;;  %s1385_s28 = sld [smem:[#allocation2 + $0x15]]  ;;  %s1387_s29 = sld [smem:[#allocation2 + $0x16]] }
  0x34   : > { %v315_v12 = vrot.slane %v308_v63, %v1283_v36  ;;  %v654_v13 = vadd.f32 %v652_v2, %v639_v1  ;;  %v632_v16 = vstv %s1289_s6  ;;  %v645_v17 = vstv %s1291_s7  ;;  %s1397_s30 = sld [smem:[#allocation2 + $0x17]]  ;;  %s1089_s3 = sld [smem:[#allocation2 + $0x10]] }
  0x35   : > { %v668_v20 = vadd.f32 %v666_v10, %v653_v7  ;;  %v633_v21 = vmul.f32 %v632_v16, %v1240_v5  ;;  %v634_v22 = vmul.f32 %v1243_v6, %v632_v16  ;;  %v646_v23 = vmul.f32 %v1246_v8, %v645_v17  ;;  %s1090_s4 = sld [smem:[#allocation2 + $0x11]]  ;;  %s1091_s5 = sld [smem:[#allocation2 + $0x12]] }
  0x36   : > { %v323_v24 = vrot.slane %v315_v12, %v1283_v36  ;;  %v669_v25 = vadd.f32 %v667_v11, %v654_v13  ;;  %v647_v26 = vmul.f32 %v1249_v9, %v645_v17  ;;  %v316_v27 = vcombine.high %v315_v12, %v315_v12  ;;  %s1092_s6 = sld [smem:[#allocation2 + $0x13]]  ;;  %s1179_s7 = smov 16  }
  0x37   : > { %375 = vrot.lane.b32.xlu1 %v370_v4, %s1177_s12  ;;  %v648_v28 = vadd.f32 %v646_v23, %v633_v21  ;;  %v660_v29 = vstv %s1300_s8  ;;  %v675_v30 = vstv %s1302_s11  ;;  %v629_v42 = vstv %s1314_s13  ;;  %s1180_s8 = smov 112   ;;  %s1109_s11 = sld [smem:[#allocation2 + $0x24]] }
  0x38   : > { %333 = vrot.lane.b32.xlu0 %v323_v24, %s1178_s18  ;;  %v682_v31 = vcombine.low %v668_v20, %v669_v25  ;;  %v649_v32 = vadd.f32 %v647_v26, %v634_v22  ;;  %v661_v33 = vmul.f32 %v1255_v14, %v660_v29  ;;  %v662_v34 = vmul.f32 %v1258_v15, %v660_v29  ;;  %p157_p1 = scmp.lt.s32.totalorder %s1202_s10, 1 }
  0x39   : > { %v676_v35 = vmul.f32 %v1263_v18, %v675_v30  ;;  %v677_v37 = vmul.f32 %v1266_v19, %v675_v30  ;;  %v330_v40 = vrot.slane %v316_v27, %v1283_v36  ;;  %v630_v46 = vmul.f32 %v629_v42, %v1240_v5 }
  0x3a   : > { %v689_v38 = vrot.slane %v682_v31, %v1283_v36  ;;  %v663_v39 = vadd.f32 %v661_v33, %v648_v28  ;;  %v664_v41 = vadd.f32 %v662_v34, %v649_v32  ;;  %v631_v48 = vmul.f32 %v1243_v6, %v629_v42  ;;  %s1594_s10 = smov (!%p157_p1, %s1202_s10), 1 }
  0x3b   : > { %v640_v49 = vstv %s1322_s14  ;;  %v655_v50 = vstv %s1324_s15  ;;  %v670_v57 = vstv %s1331_s16  ;;  %v255_v58 = vstv %s1333_s17 }
  0x3c   : > { %v697_v43 = vrot.slane %v689_v38, %v1283_v36  ;;  %v690_v44 = vcombine.high %v689_v38, %v689_v38  ;;  %v678_v45 = vadd.f32 %v676_v35, %v663_v39  ;;  %v679_v47 = vadd.f32 %v677_v37, %v664_v41 }
  0x3d   : > { %v641_v52 = vmul.f32 %v1246_v8, %v640_v49  ;;  %v642_v53 = vmul.f32 %v1249_v9, %v640_v49  ;;  %v656_v54 = vmul.f32 %v1255_v14, %v655_v50  ;;  %v657_v56 = vmul.f32 %v1258_v15, %v655_v50 }
  0x3e   : > { %707 = vrot.lane.b32.xlu0 %v697_v43, %s1178_s18  ;;  %v704_v51 = vrot.slane %v690_v44, %v1283_v36  ;;  %v717_v55 = vcombine.low %v678_v45, %v679_v47  ;;  %v671_v61 = vmul.f32 %v1263_v18, %v670_v57  ;;  %v672_v62 = vmul.f32 %v1266_v19, %v670_v57 }
  0x3f   : > { %v643_v59 = vadd.f32 %v641_v52, %v630_v46  ;;  %v644_v60 = vadd.f32 %v642_v53, %v631_v48  ;;  %v256_v1 = vmul.f32 %v255_v58, %v1240_v5  ;;  %v257_v2 = vmul.f32 %v1243_v6, %v255_v58 }
  0x40   : > { %709 = vrot.lane.b32.xlu1 %v704_v51, %s1178_s18  ;;  %v724_v63 = vrot.slane %v717_v55, %v1283_v36  ;;  %v266_v3 = vstv %s1340_s19  ;;  %v281_v16 = vstv %s1345_s20  ;;  %v296_v17 = vstv %s1347_s21 }
  0x41   : > { %v658_v4 = vadd.f32 %v656_v54, %v643_v59  ;;  %v659_v7 = vadd.f32 %v657_v56, %v644_v60  ;;  %v267_v10 = vmul.f32 %v1246_v8, %v266_v3  ;;  %v268_v11 = vmul.f32 %v1249_v9, %v266_v3 }
  0x42   : > { %335 = vrot.lane.b32.xlu0 %v330_v40, %s1178_s18  ;;  %v725_v12 = vcombine.high %v724_v63, %v724_v63  ;;  %v732_v13 = vrot.slane %v724_v63, %v1283_v36  ;;  %v282_v25 = vmul.f32 %v1255_v14, %v281_v16  ;;  %v283_v26 = vmul.f32 %v1258_v15, %v281_v16 }
  0x43   : > { %v1389_v20 = vadd.f32 %v671_v61, %v658_v4  ;;  %v1391_v21 = vadd.f32 %v672_v62, %v659_v7  ;;  %v269_v22 = vadd.f32 %v267_v10, %v256_v1  ;;  %v270_v23 = vadd.f32 %v268_v11, %v257_v2 }
  0x44   : > { %v739_v24 = vrot.slane %v725_v12, %v1283_v36  ;;  %v297_v27 = vmul.f32 %v1263_v18, %v296_v17  ;;  %v298_v28 = vmul.f32 %v1266_v19, %v296_v17  ;;  %v444_v29 = vstv %s1354_s22 }
  0x45   : > { %v453_v30 = vstv %s1361_s23  ;;  %v468_v31 = vstv %s1363_s24  ;;  %v284_v32 = vadd.f32 %v282_v25, %v269_v22  ;;  %v285_v33 = vadd.f32 %v283_v26, %v270_v23 }
  0x46   : > { %742 = vrot.lane.b32.xlu0 %v732_v13, %s1177_s12  ;;  %744 = vrot.lane.b32.xlu1 %v739_v24, %s1177_s12  ;;  %v445_v34 = vmul.f32 %v444_v29, %v1240_v5  ;;  %v446_v35 = vmul.f32 %v1243_v6, %v444_v29  ;;  %v454_v37 = vmul.f32 %v1246_v8, %v453_v30  ;;  %v483_v43 = vstv %s1375_s25 }
  0x47   : > { %v455_v38 = vmul.f32 %v1249_v9, %v453_v30  ;;  %v469_v39 = vmul.f32 %v1255_v14, %v468_v31  ;;  %v470_v40 = vmul.f32 %v1258_v15, %v468_v31  ;;  %v1411_v41 = vadd.f32 %v297_v27, %v284_v32 }
  0x48   : > { %v1413_v42 = vadd.f32 %v298_v28, %v285_v33  ;;  %v450_v44 = vstv %s1377_s26  ;;  %v456_v45 = vadd.f32 %v454_v37, %v445_v34  ;;  %v484_v47 = vmul.f32 %v1263_v18, %v483_v43 }
  0x49   : > { %v457_v46 = vadd.f32 %v455_v38, %v446_v35  ;;  %v485_v48 = vmul.f32 %v1266_v19, %v483_v43  ;;  %v451_v49 = vmul.f32 %v450_v44, %v1240_v5  ;;  %v452_v50 = vmul.f32 %v1243_v6, %v450_v44 }
  0x4a   : > { %v463_v51 = vstv %s1385_s28  ;;  %v478_v52 = vstv %s1387_s29  ;;  %v471_v53 = vadd.f32 %v469_v39, %v456_v45  ;;  %v493_v59 = vstv %s1397_s30 }
  0x4b   : > { %v472_v54 = vadd.f32 %v470_v40, %v457_v46  ;;  %v464_v55 = vmul.f32 %v1246_v8, %v463_v51  ;;  %v465_v56 = vmul.f32 %v1249_v9, %v463_v51  ;;  %v479_v57 = vmul.f32 %v1255_v14, %v478_v52 }
  0x4c   : > { %v480_v58 = vmul.f32 %v1258_v15, %v478_v52  ;;  %v486_v60 = vadd.f32 %v484_v47, %v471_v53  ;;  %v494_v1 = vmul.f32 %v1263_v18, %v493_v59  ;;  %v495_v2 = vmul.f32 %v1266_v19, %v493_v59 }
  0x4d   : > { %v487_v61 = vadd.f32 %v485_v48, %v472_v54  ;;  %v466_v62 = vadd.f32 %v464_v55, %v451_v49  ;;  %v467_v63 = vadd.f32 %v465_v56, %v452_v50  ;;  %v447_v22 = vstv %s1089_s3 }
  0x4e   : > { %v458_v23 = vstv %s1090_s4  ;;  %v448_v26 = vmul.f32 %v447_v22, %v1240_v5  ;;  %v449_v27 = vmul.f32 %v1243_v6, %v447_v22  ;;  %v473_v30 = vstv %s1091_s5 }
  0x4f   : > { %v500_v3 = vcombine.low %v486_v60, %v487_v61  ;;  %v481_v4 = vadd.f32 %v479_v57, %v466_v62  ;;  %v482_v7 = vadd.f32 %v480_v58, %v467_v63  ;;  %v459_v28 = vmul.f32 %v1246_v8, %v458_v23 }
  0x50   : > { %v460_v29 = vmul.f32 %v1249_v9, %v458_v23  ;;  %v488_v31 = vstv %s1092_s6  ;;  %v474_v34 = vmul.f32 %v1255_v14, %v473_v30  ;;  %v475_v35 = vmul.f32 %v1258_v15, %v473_v30 }
  0x51   : > { %v507_v10 = vrot.slane %v500_v3, %v1283_v36  ;;  %v496_v11 = vadd.f32 %v494_v1, %v481_v4  ;;  %v497_v12 = vadd.f32 %v495_v2, %v482_v7  ;;  %v461_v37 = vadd.f32 %v459_v28, %v448_v26 }
  0x52   : > { %v462_v38 = vadd.f32 %v460_v29, %v449_v27  ;;  %v489_v5 = vmul.f32 %v1263_v18, %v488_v31  ;;  %v490_v6 = vmul.f32 %v1266_v19, %v488_v31  ;;  %v1453_v14 = vand.u32 127, %v198_v0 }
  0x53   : > { %v508_v13 = vcombine.high %v507_v10, %v507_v10  ;;  %v515_v16 = vrot.slane %v507_v10, %v1283_v36  ;;  %v535_v17 = vcombine.low %v496_v11, %v497_v12  ;;  %v476_v9 = vadd.f32 %v474_v34, %v461_v37 }
  0x54   : > { %v477_v39 = vadd.f32 %v475_v35, %v462_v38  ;;  %v1456_v15 = vadd.s32 128, %v1453_v14  ;;  %v205_v19 = vand.u32 15, %v1453_v14  ;;  %vm377_vm0 = vcmp.lt.s32.totalorder %v1453_v14, 127 }
  0x55   : > { %v522_v24 = vrot.slane %v508_v13, %v1283_v36  ;;  %525 = vrot.lane.b32.xlu0 %v515_v16, %s1178_s18  ;;  %v542_v25 = vrot.slane %v535_v17, %v1283_v36  ;;  %v1448_v40 = vadd.f32 %v489_v5, %v476_v9  ;;  %vm337_vm3 = vcmp.lt.s32.totalorder %v1453_v14, 1 }
  0x56   : > { %v1450_v43 = vadd.f32 %v490_v6, %v477_v39  ;;  %v212_v44 = vand.u32 15, %v1456_v15  ;;  %vm1461_vm1 = vcmp.lt.s32.totalorder %v205_v19, 15  ;;  %vm1478_vm4 = vcmp.gt.s32.totalorder %v205_v19, 0 }
  0x57   : > { %527 = vrot.lane.b32.xlu1 %v522_v24, %s1178_s18  ;;  %v543_v32 = vcombine.high %v542_v25, %v542_v25  ;;  %v550_v33 = vrot.slane %v542_v25, %v1283_v36  ;;  %vm842_vm6 = vcmp.lt.s32.totalorder %v1453_v14, 16  ;;  %vm229_vm7 = vcmp.ge.s32.totalorder %v1453_v14, 16 }
  0x58   : > { %vm1465_vm2 = vcmp.lt.s32.totalorder %v212_v44, 15  ;;  %vm1482_vm5 = vcmp.gt.s32.totalorder %v212_v44, 0  ;;  %vm911_vm8 = vcmp.lt.s32.totalorder %v1453_v14, 112  ;;  %vm232_vm9 = vcmp.lt.s32.totalorder %v1456_v15, 240 }
  0x59   : > { %v557_v8 = vrot.slane %v543_v32, %v1283_v36  ;;  %560 = vrot.lane.b32.xlu0 %v550_v33, %s1177_s12 }
  0x5b   : > { %562 = vrot.lane.b32.xlu1 %v557_v8, %s1177_s12 }
  0xa5   : > { %v374_v18 = vpop.permute.xlu1 %373 }
  0xa9   : > { %v376_v45 = vpop.permute.xlu1 %375 }
  0xaa   : > { %v334_v46 = vpop.permute.xlu0 %333  ;;  %v378_v0 = vsel %vm377_vm0, %v374_v18, %v376_v45  ;;  %v379_v49 = vsel %vm377_vm0, %v376_v45, %v374_v18 }
  0xab   : > { %v384_v50 = vsel %vm1461_vm1, %v378_v0, 0.0  ;;  %v385_v51 = vsel %vm1465_vm2, %v379_v49, 0.0 }
  0xac   : > { %v417_v55 = vcombine.low %v384_v50, %v385_v51 }
  0xae   : > { %v424_v2 = vrot.slane %v417_v55, %v1283_v36 }
  0xb0   : > { %v708_v52 = vpop.permute.xlu0 %707  ;;  %v425_v16 = vcombine.high %v424_v2, %v424_v2  ;;  %v432_v31 = vrot.slane %v424_v2, %v1283_v36 }
  0xb2   : > { %v710_v56 = vpop.permute.xlu1 %709  ;;  %v439_v32 = vrot.slane %v425_v16, %v1283_v36 }
  0xb3   : > { %v711_v57 = vsel %vm337_vm3, %v708_v52, %v710_v56  ;;  %v712_v58 = vsel %vm337_vm3, %v710_v56, %v708_v52 }
  0xb4   : > { %v713_v59 = vsel %vm1478_vm4, %v712_v58, 0.0  ;;  %v714_v60 = vsel %vm1482_vm5, %v711_v57, 0.0  ;;  %v336_v61 = vpop.permute.xlu0 %335 }
  0xb5   : > { %v752_v62 = vcombine.low %v713_v59, %v714_v60  ;;  %v338_v63 = vsel %vm337_vm3, %v334_v46, %v336_v61  ;;  %v339_v1 = vsel %vm337_vm3, %v336_v61, %v334_v46 }
  0xb6   : > { %v344_v3 = vsel %vm1478_vm4, %v339_v1, 0.0  ;;  %v345_v4 = vsel %vm1482_vm5, %v338_v63, 0.0 }
  0xb7   : > { %v759_v7 = vrot.slane %v752_v62, %v1283_v36  ;;  %v388_v10 = vcombine.low %v344_v3, %v345_v4 }
  0xb8   : > { %v743_v11 = vpop.permute.xlu0 %742  ;;  %v745_v13 = vpop.permute.xlu1 %744 }
  0xb9   : > { %v395_v12 = vrot.slane %v388_v10, %v1283_v36  ;;  %v746_v17 = vsel %vm377_vm0, %v743_v11, %v745_v13  ;;  %v747_v22 = vsel %vm377_vm0, %v745_v13, %v743_v11  ;;  %v760_v23 = vcombine.high %v759_v7, %v759_v7 }
  0xba   : > { %v748_v26 = vsel %vm1461_vm1, %v746_v17, 0.0  ;;  %v749_v27 = vsel %vm1465_vm2, %v747_v22, 0.0  ;;  %v767_v33 = vrot.slane %v759_v7, %v1283_v36 }
  0xbb   : > { %v396_v24 = vcombine.high %v395_v12, %v395_v12  ;;  %v403_v25 = vrot.slane %v395_v12, %v1283_v36  ;;  %v781_v30 = vcombine.low %v748_v26, %v749_v27  ;;  %v774_v34 = vrot.slane %v760_v23, %v1283_v36 }
  0xbd   : > { %v410_v28 = vrot.slane %v396_v24, %v1283_v36  ;;  %v413_v29 = vadd.f32 %v403_v25, %v1411_v41  ;;  %v788_v37 = vrot.slane %v781_v30, %v1283_v36  ;;  %v777_v41 = vadd.f32 %v767_v33, %v1389_v20 }
  0xbe   : > { %v778_v9 = vadd.f32 %v774_v34, %v1391_v21 }
  0xbf   : > { %v414_v35 = vadd.f32 %v410_v28, %v1413_v42  ;;  %v789_v38 = vcombine.high %v788_v37, %v788_v37  ;;  %v796_v5 = vrot.slane %v788_v37, %v1283_v36  ;;  %v442_v6 = vadd.f32 %v432_v31, %v413_v29 }
  0xc1   : > { %v443_v8 = vadd.f32 %v439_v32, %v414_v35  ;;  %v803_v39 = vrot.slane %v789_v38, %v1283_v36  ;;  %v806_v19 = vadd.f32 %v796_v5, %v777_v41  ;;  %v808_v32 = vstv %s1109_s11 }
  0xc3   : > { %v813_v18 = vcombine.low %v442_v6, %v443_v8  ;;  %v807_v45 = vadd.f32 %v803_v39, %v778_v9  ;;  %v1117_v9 = vld [vmem:[%s1234_s27 + $0x4] ss:$8 sm:$0x3] }
  0xc5   : > { %v820_v44 = vrot.slane %v813_v18, %v1283_v36  ;;  %v882_v0 = vcombine.low %v806_v19, %v807_v45 }
  0xc7   : > { %v828_v42 = vrot.slane %v820_v44, %v1283_v36  ;;  %v821_v46 = vcombine.high %v820_v44, %v820_v44  ;;  %v526_v49 = vpop.permute.xlu0 %525  ;;  %v889_v20 = vrot.slane %v882_v0, %v1283_v36  ;;  %v1118_v44 = vld [vmem:[%s1234_s27 + $0x14] ss:$8 sm:$0x3]  ;;  %s1073_s27 = sshll.u32 %s1594_s10, 3 }
  0xc8   : > { %s160_s15 = scalar_lea.vmem %s1581_s2, %s1073_s27 }
  0xc9   : > { %838 = vrot.lane.b32.xlu0 %v828_v42, %s1179_s7  ;;  %v835_v50 = vrot.slane %v821_v46, %v1283_v36  ;;  %v528_v51 = vpop.permute.xlu1 %527  ;;  %v897_v21 = vrot.slane %v889_v20, %v1283_v36  ;;  %v890_v52 = vcombine.high %v889_v20, %v889_v20 }
  0xca   : > { %v529_v55 = vsel %vm337_vm3, %v526_v49, %v528_v51  ;;  %v530_v56 = vsel %vm337_vm3, %v528_v51, %v526_v49 }
  0xcb   : > { %840 = vrot.lane.b32.xlu1 %v835_v50, %s1179_s7  ;;  %v531_v57 = vsel %vm1478_vm4, %v530_v56, 0.0  ;;  %v532_v58 = vsel %vm1482_vm5, %v529_v55, 0.0  ;;  %v561_v59 = vpop.permute.xlu0 %560  ;;  %v904_v60 = vrot.slane %v890_v52, %v1283_v36 }
  0xcc   : > { %v570_v61 = vcombine.low %v531_v57, %v532_v58 }
  0xcd   : > { %907 = vrot.lane.b32.xlu0 %v897_v21, %s1180_s8  ;;  %v563_v62 = vpop.permute.xlu1 %562 }
  0xce   : > { %v577_v63 = vrot.slane %v570_v61, %v1283_v36  ;;  %v564_v1 = vsel %vm377_vm0, %v561_v59, %v563_v62  ;;  %v565_v53 = vsel %vm377_vm0, %v563_v62, %v561_v59 }
  0xcf   : > { %909 = vrot.lane.b32.xlu1 %v904_v60, %s1180_s8  ;;  %v566_v54 = vsel %vm1461_vm1, %v564_v1, 0.0  ;;  %v567_v2 = vsel %vm1465_vm2, %v565_v53, 0.0 }
  0xd0   : > { %v578_v3 = vcombine.high %v577_v63, %v577_v63  ;;  %v585_v4 = vrot.slane %v577_v63, %v1283_v36  ;;  %v599_v7 = vcombine.low %v566_v54, %v567_v2 }
  0xd2   : > { %v592_v10 = vrot.slane %v578_v3, %v1283_v36  ;;  %v595_v11 = vadd.f32 %v585_v4, %v1448_v40  ;;  %v606_v12 = vrot.slane %v599_v7, %v1283_v36 }
  0xd4   : > { %v596_v13 = vadd.f32 %v592_v10, %v1450_v43  ;;  %v607_v16 = vcombine.high %v606_v12, %v606_v12  ;;  %v614_v17 = vrot.slane %v606_v12, %v1283_v36 }
  0xd6   : > { %v621_v47 = vrot.slane %v607_v16, %v1283_v36  ;;  %v624_v22 = vadd.f32 %v614_v17, %v595_v11 }
  0xd8   : > { %v625_v48 = vadd.f32 %v621_v47, %v596_v13  ;;  %v809_v38 = vadd.f32 %v808_v32, %v624_v22 }
  0xda   : > { %v810_v15 = vadd.f32 %v808_v32, %v625_v48 }
 0x13b   : > { %v839_v23 = vpop.permute.xlu0 %838 }
 0x13d   : > { %v841_v24 = vpop.permute.xlu1 %840 }
 0x13e   : > { %v843_v25 = vsel %vm842_vm6, %v839_v23, %v841_v24  ;;  %v844_v40 = vsel %vm842_vm6, %v841_v24, %v839_v23 }
 0x13f   : > { %v849_v26 = vsel %vm229_vm7, %v844_v40, 0.0  ;;  %v908_v27 = vpop.permute.xlu0 %907 }
 0x140   : > { %v853_v43 = vcombine.low %v849_v26, %v843_v25 }
 0x141   : > { %v910_v28 = vpop.permute.xlu1 %909 }
 0x142   : > { %v860_v29 = vrot.slane %v853_v43, %v1283_v36  ;;  %v912_v30 = vsel %vm911_vm8, %v908_v27, %v910_v28  ;;  %v913_v31 = vsel %vm911_vm8, %v910_v28, %v908_v27 }
 0x143   : > { %v919_v33 = vsel %vm232_vm9, %v913_v31, 0.0 }
 0x144   : > { %v861_v34 = vcombine.high %v860_v29, %v860_v29  ;;  %v868_v35 = vrot.slane %v860_v29, %v1283_v36  ;;  %v922_v37 = vcombine.low %v912_v30, %v919_v33 }
 0x146   : > { %v875_v14 = vrot.slane %v861_v34, %v1283_v36  ;;  %v929_v5 = vrot.slane %v922_v37, %v1283_v36  ;;  %v878_v6 = vadd.f32 %v868_v35, %v809_v38 }
 0x148   : > { %v930_v8 = vcombine.high %v929_v5, %v929_v5  ;;  %v937_v41 = vrot.slane %v929_v5, %v1283_v36  ;;  %v879_v39 = vadd.f32 %v875_v14, %v810_v15 }
 0x14a   : > { %v944_v18 = vrot.slane %v930_v8, %v1283_v36  ;;  %v947_v19 = vadd.f32 %v937_v41, %v878_v6 }
 0x14c   : > { %v948_v45 = vadd.f32 %v944_v18, %v879_v39  ;;  %v949_v42 = vsub.f32 %v947_v19, %v1117_v9 }
 0x14e   : > { %v950_v46 = vsub.f32 %v948_v45, %v1118_v44  ;;  %v951_v0 = vand.u32 2147483647, %v949_v42 }
 0x150   : > { %v952_v49 = vand.u32 2147483647, %v950_v46 }
 0x152   : > { %v957_v50 = vcombine.low %v951_v0, %v952_v49 }
 0x154   : > { %v964_v20 = vrot.slane %v957_v50, %v1283_v36 }
 0x156   : > { %v965_v51 = vcombine.high %v964_v20, %v964_v20  ;;  %v972_v21 = vrot.slane %v964_v20, %v1283_v36 }
 0x158   : > { %v979_v52 = vrot.slane %v965_v51, %v1283_v36  ;;  %v983_v55 = vsel %vm982_vm10, %v972_v21, 0.0 }
 0x15a   : > { %v984_v56 = vsel %vm982_vm10, %v979_v52, 0.0 }
 0x15b   : > { %v985_v57 = vadd.f32 %v984_v56, %v983_v55 }
 0x15d   : > { %986 = vadd.xlane.f32.xlu0 %v985_v57 }
 0x1ea   : > { %v987_v58 = vpop.xlane.xlu0 %986 }
 0x1eb   : > { %v988_v59 = vrot.slane %v987_v58, 4 }
 0x1ed   : > { %v989_v60 = vadd.f32 %v988_v59, %v987_v58 }
 0x1ef   : > { %v990_v61 = vrot.slane %v989_v60, 2 }
 0x1f1   : > { %v991_v62 = vadd.f32 %v990_v61, %v989_v60 }
 0x1f3   : > { %v992_v63 = vrot.slane %v991_v62, 1 }
 0x1f5   : > { %v993_v1 = vadd.f32 %v992_v63, %v991_v62 }
 0x1f7   : > { %1122 = vpush %v993_v1 }
 0x228   : > { %s1123_s12 = spop %1122 }
 0x229   : > { %s995_s16 = smul.f32 0.00390625, %s1123_s12 }
 0x22b   : > { %v996_v36 = vstv %s995_s16 }
 0x22c   : > { %997 = vst [vmem:[%s160_s15] sm:$0xff] %v996_v36 }
 0x22d PF: > { %s13_s9 = sadd.s32 1, %s1173_s9  }
 0x22e   : > { %p10_p2 = scmp.ge.s32.totalorder %s13_s9, 4  }
 0x230   :  { %12 = sbr.rel (!%p10_p2) target bundleno = 1 (0x1), region = 72 }
 0x237   :  { %1017 = vsyncpa [#allocation3], 1 }
 0x238   :  { %1019 = vsyncpa [#allocation3 + $0x1], 1 }

</bundles_post_ra>
